<compile_context>
chip_gen: v6e
topology: v6e:2x2x1
jax: 0.10.0
libtpu: 0.0.40
codegen_flags: <defaults>
</compile_context>

<pallas_src>
import math

import numpy as np

import jax
import jax.numpy as jnp
from jax import lax
from jax.experimental import pallas as pl
from jax.experimental.pallas import tpu as pltpu


# ----------------------------- pooling geometry -----------------------------

def _level_params(h, w, level):
    """Replicates the kernel/stride/padding arithmetic of the torch module."""
    kh = math.ceil(h / level)
    kw = math.ceil(w / level)
    ph = math.floor((kh * level - h + 1) / 2)
    pw = math.floor((kw * level - w + 1) / 2)
    # F.max_pool2d / F.avg_pool2d output size (ceil_mode=False):
    oh = (h + 2 * ph - kh) // kh + 1
    ow = (w + 2 * pw - kw) // kw + 1
    return kh, kw, ph, pw, oh, ow


def _clipped_window(oy, ox, kh, kw, ph, pw, h, w):
    ys = max(oy * kh - ph, 0)
    ye = min(oy * kh - ph + kh, h)
    xs = max(ox * kw - pw, 0)
    xe = min(ox * kw - pw + kw, w)
    # Defensive: torch requires pad <= kernel/2, so windows are never empty.
    assert ye > ys and xe > xs, "empty pooling window (pad > kernel/2?)"
    return ys, ye, xs, xe


def _round_up(v, m):
    return ((v + m - 1) // m) * m


# --------------------------- sizing / VMEM budget ----------------------------

def _vmem_capacity_bytes():
    try:
        return int(pltpu.get_tpu_info().vmem_capacity_bytes)
    except Exception:
        return 64 * 1024 * 1024   # conservative fallback (v7x per-TC VMEM)


def _pick_lane_block(nc, h, w, p_total, in_itemsize, budget):
    """Choose the lane-block size (multiple of 128) for the packed n*c axis.

    Constraints:
      * double-buffered input block + intermediates + double-buffered output
        stay inside `budget` bytes of VMEM,
      * >= 2 grid steps whenever there are >= 2 lane units (128-wide groups),
        so dimension_semantics=('parallel',) can shard across v7x's two TCs,
      * the block divides the 128-padded lane extent exactly (no partial
        blocks, padding wrapper-side only up to the next multiple of 128).
    """
    nc128 = _round_up(nc, 128)
    n_units = nc128 // 128
    # Per-lane-column bytes: 2x input (double-buffered) + f32 slack for
    # in-kernel intermediates + output vectors / double-buffered output.
    per_lane = h * w * (2 * in_itemsize + 4) + 4 * p_total * 4
    max_units = max(1, (budget // max(per_lane, 1)) // 128)
    if n_units >= 2:
        max_units = min(max_units, (n_units + 1) // 2)   # force >= 2 blocks
    units = 1
    for u in range(min(max_units, n_units), 0, -1):
        if n_units % u == 0:
            units = u
            break
    return units * 128, nc128


# --------------------------------- kernels -----------------------------------

def _make_max_kernel(h, w, params):
    """Max pooling over the whole pyramid for an (h, w, lane_block) block.

    Every window is a static ref slice (no f32 materialization); reductions
    run in the input dtype. All p_total results are written with one
    lane-dense store.
    """
    windows = []
    for (kh, kw, ph, pw, oh, ow) in params:
        for oy in range(oh):
            for ox in range(ow):
                windows.append(_clipped_window(oy, ox, kh, kw, ph, pw, h, w))

    def kernel(x_ref, o_ref):
        vals = []
        for (ys, ye, xs, xe) in windows:
            # Clipping to the valid region is exact for max pooling
            # (implicit -inf padding in F.max_pool2d).
            win = x_ref[ys:ye, xs:xe, :]                 # (wh, ww, lb), x dtype
            red = jnp.max(win, axis=0)                   # rows: VPU elementwise
            vals.append(jnp.max(red, axis=0, keepdims=True))   # cols: sublane
        o_ref[...] = jnp.concatenate(vals, axis=0).astype(o_ref.dtype)

    return kernel


def _avg_kernel(pm_ref, x_ref, o_ref):
    """Avg pooling: ONE MXU matmul per grid step, one lane-dense store.
    out(p_total, lb) = pool_mat(p_total, h*w) @ x(h*w, lb)."""
    xf = x_ref[...].astype(jnp.float32)
    res = jnp.dot(pm_ref[...], xf, preferred_element_type=jnp.float32)
    o_ref[...] = res.astype(o_ref.dtype)


def _avg_pool_matrix(h, w, params, p_total):
    """Static (p_total, h*w) f32 matrix: 1/(kh*kw) on in-window (valid) pixels.
    Padded pixels contribute 0 but the divisor stays kh*kw, reproducing
    F.avg_pool2d's count_include_pad=True exactly. Kept in f32 (do not
    downcast: 1/(kh*kw) weights lose ~0.4% in bf16 for no speedup)."""
    mat = np.zeros((p_total, h * w), dtype=np.float32)
    pos = 0
    for (kh, kw, ph, pw, oh, ow) in params:
        inv = 1.0 / (kh * kw)
        for oy in range(oh):
            for ox in range(ow):
                ys, ye, xs, xe = _clipped_window(oy, ox, kh, kw, ph, pw, h, w)
                for yy in range(ys, ye):
                    mat[pos, yy * w + xs:yy * w + xe] = inv
                pos += 1
    return jnp.asarray(mat)


# --------------------------------- wrapper ------------------------------------

def spp_layer(x, num_levels=3, pool_type='max_pool'):
    """Pallas SPPLayer forward.  x: (N, C, H, W) -> (N, C * sum_L oh_L*ow_L)."""
    n, c, h, w = x.shape
    params = [_level_params(h, w, i + 1) for i in range(num_levels)]
    p_total = sum(oh * ow for (*_, oh, ow) in params)
    nc = n * c

    vmem_cap = _vmem_capacity_bytes()
    budget = (vmem_cap * 2) // 5                    # ~25 MiB v7x, ~51 MiB v5e/v6e
    lb, nc_pad = _pick_lane_block(nc, h, w, p_total, x.dtype.itemsize, budget)
    grid = (nc_pad // lb,)

    compiler_params = pltpu.CompilerParams(
        dimension_semantics=("parallel",),          # lane blocks independent
        vmem_limit_bytes=min(vmem_cap // 2, 100 * 1024 * 1024),
    )
    out_shape = jax.ShapeDtypeStruct((p_total, nc_pad), x.dtype)
    out_spec = pl.BlockSpec((p_total, lb), lambda i: (0, i))

    if pool_type == 'max_pool':
        # Layout plumbing only: batch*channels on the lane axis.
        x_packed = jnp.transpose(x, (2, 3, 0, 1)).reshape(h, w, nc)
        if nc_pad > nc:
            x_packed = jnp.pad(x_packed, ((0, 0), (0, 0), (0, nc_pad - nc)))
        out = pl.pallas_call(
            _make_max_kernel(h, w, params),
            out_shape=out_shape,
            grid_spec=pltpu.PrefetchScalarGridSpec(
                num_scalar_prefetch=0,
                grid=grid,
                in_specs=[pl.BlockSpec((h, w, lb), lambda i: (0, 0, i))],
                out_specs=out_spec,
            ),
            compiler_params=compiler_params,
        )(x_packed)
    else:
        x_flat = jnp.transpose(x, (2, 3, 0, 1)).reshape(h * w, nc)
        if nc_pad > nc:
            x_flat = jnp.pad(x_flat, ((0, 0), (0, nc_pad - nc)))
        pool_mat = _avg_pool_matrix(h, w, params, p_total)
        out = pl.pallas_call(
            _avg_kernel,
            out_shape=out_shape,
            grid_spec=pltpu.PrefetchScalarGridSpec(
                num_scalar_prefetch=0,
                grid=grid,
                in_specs=[pl.BlockSpec((p_total, h * w), lambda i: (0, 0)),
                          pl.BlockSpec((h * w, lb), lambda i: (0, i))],
                out_specs=out_spec,
            ),
            compiler_params=compiler_params,
        )(pool_mat, x_flat)

    # Wrapper glue on the tiny pooled tensor: drop lane padding, then per-level
    # channel-major flatten + concat, matching torch's pooled.view(num, -1) /
    # torch.cat((..., ...), 1) exactly.
    out = out[:, :nc].reshape(p_total, n, c)
    out = jnp.transpose(out, (1, 2, 0))             # (n, c, p_total)
    chunks, off = [], 0
    for (*_, oh, ow) in params:
        chunks.append(out[:, :, off:off + oh * ow].reshape(n, c * oh * ow))
        off += oh * ow
    return jnp.concatenate(chunks, axis=1)


# ------------------------------- pure-JAX ref ---------------------------------

def spp_layer_ref(x, num_levels=3, pool_type='max_pool'):
    """Pure-JAX reference (mirrors F.max_pool2d / F.avg_pool2d semantics)."""
    n, c, h, w = x.shape
    outs = []
    for i in range(num_levels):
        kh, kw, ph, pw, _, _ = _level_params(h, w, i + 1)
        if pool_type == 'max_pool':
            pooled = lax.reduce_window(
                x, -jnp.inf, lax.max,
                (1, 1, kh, kw), (1, 1, kh, kw),
                ((0, 0), (0, 0), (ph, ph), (pw, pw)))
        else:
            pooled = lax.reduce_window(
                x, 0.0, lax.add,
                (1, 1, kh, kw), (1, 1, kh, kw),
                ((0, 0), (0, 0), (ph, ph), (pw, pw))) / (kh * kw)
        outs.append(pooled.reshape(n, -1))
    return jnp.concatenate(outs, axis=1)


if __name__ == "__main__":
    # SPPLayer has no learnable parameters; only the input is needed.
    num_levels = 3
    key = jax.random.PRNGKey(0)
    x = jax.random.normal(key, (2, 4, 16, 16), dtype=jnp.float32)

    spp = jax.jit(spp_layer, static_argnums=(1, 2))

    # max pooling (module default)
    y_max = jax.block_until_ready(spp(x, num_levels, 'max_pool'))
    y_max_ref = jax.block_until_ready(spp_layer_ref(x, num_levels, 'max_pool'))
    assert y_max.shape == (2, 4 * (1 + 4 + 9)), y_max.shape
    assert jnp.allclose(y_max, y_max_ref, atol=1e-6, rtol=1e-6), "max_pool mismatch"

    # avg pooling (MXU pooling-matrix path)
    y_avg = jax.block_until_ready(spp(x, num_levels, 'avg_pool'))
    y_avg_ref = jax.block_until_ready(spp_layer_ref(x, num_levels, 'avg_pool'))
    assert y_avg.shape == (2, 4 * (1 + 4 + 9)), y_avg.shape
    assert jnp.allclose(y_avg, y_avg_ref, atol=1e-5, rtol=1e-5), "avg_pool mismatch"

    print("KERNEL_OK")
</pallas_src>

<mosaic_0001>
module attributes {stable_mosaic.version = 11 : i64} {
  func.func @kernel(%arg0: i32, %arg1: memref<16x16x128xf32, #tpu.memory_space<vmem>>, %arg2: memref<14x128xf32, #tpu.memory_space<vmem>>) attributes {dimension_semantics = [#tpu.dimension_semantics<parallel>], iteration_bounds = array<i64: 1>, scalar_prefetch = 0 : i64, scratch_operands = 0 : i64, tpu.core_type = #tpu.core_type<tc>, window_params = [{transform_indices = @transform_0, window_bounds = array<i64: 16, 16, 128>}, {transform_indices = @transform_1, window_bounds = array<i64: 14, 128>}]} {
    %c0 = arith.constant 0 : index
    %c0_0 = arith.constant 0 : index
    %c0_1 = arith.constant 0 : index
    %0 = vector.load %arg1[%c0, %c0_0, %c0_1] : memref<16x16x128xf32, #tpu.memory_space<vmem>>, vector<16x16x128xf32>
    %cst = arith.constant dense<0xFF800000> : vector<16x128xf32>
    %1 = vector.multi_reduction <maximumf>, %0, %cst [0] : vector<16x16x128xf32> to vector<16x128xf32>
    %cst_2 = arith.constant dense<0xFF800000> : vector<128xf32>
    %2 = vector.multi_reduction <maximumf>, %1, %cst_2 [0] : vector<16x128xf32> to vector<128xf32>
    %3 = vector.shape_cast %2 : vector<128xf32> to vector<1x128xf32>
    %c0_3 = arith.constant 0 : index
    %c0_4 = arith.constant 0 : index
    %c0_5 = arith.constant 0 : index
    %4 = vector.load %arg1[%c0_3, %c0_4, %c0_5] : memref<16x16x128xf32, #tpu.memory_space<vmem>>, vector<8x8x128xf32>
    %cst_6 = arith.constant dense<0xFF800000> : vector<8x128xf32>
    %5 = vector.multi_reduction <maximumf>, %4, %cst_6 [0] : vector<8x8x128xf32> to vector<8x128xf32>
    %cst_7 = arith.constant dense<0xFF800000> : vector<128xf32>
    %6 = vector.multi_reduction <maximumf>, %5, %cst_7 [0] : vector<8x128xf32> to vector<128xf32>
    %7 = vector.shape_cast %6 : vector<128xf32> to vector<1x128xf32>
    %c0_8 = arith.constant 0 : index
    %c8 = arith.constant 8 : index
    %c0_9 = arith.constant 0 : index
    %8 = vector.load %arg1[%c0_8, %c8, %c0_9] : memref<16x16x128xf32, #tpu.memory_space<vmem>>, vector<8x8x128xf32>
    %cst_10 = arith.constant dense<0xFF800000> : vector<8x128xf32>
    %9 = vector.multi_reduction <maximumf>, %8, %cst_10 [0] : vector<8x8x128xf32> to vector<8x128xf32>
    %cst_11 = arith.constant dense<0xFF800000> : vector<128xf32>
    %10 = vector.multi_reduction <maximumf>, %9, %cst_11 [0] : vector<8x128xf32> to vector<128xf32>
    %11 = vector.shape_cast %10 : vector<128xf32> to vector<1x128xf32>
    %c8_12 = arith.constant 8 : index
    %c0_13 = arith.constant 0 : index
    %c0_14 = arith.constant 0 : index
    %12 = vector.load %arg1[%c8_12, %c0_13, %c0_14] : memref<16x16x128xf32, #tpu.memory_space<vmem>>, vector<8x8x128xf32>
    %cst_15 = arith.constant dense<0xFF800000> : vector<8x128xf32>
    %13 = vector.multi_reduction <maximumf>, %12, %cst_15 [0] : vector<8x8x128xf32> to vector<8x128xf32>
    %cst_16 = arith.constant dense<0xFF800000> : vector<128xf32>
    %14 = vector.multi_reduction <maximumf>, %13, %cst_16 [0] : vector<8x128xf32> to vector<128xf32>
    %15 = vector.shape_cast %14 : vector<128xf32> to vector<1x128xf32>
    %c8_17 = arith.constant 8 : index
    %c8_18 = arith.constant 8 : index
    %c0_19 = arith.constant 0 : index
    %16 = vector.load %arg1[%c8_17, %c8_18, %c0_19] : memref<16x16x128xf32, #tpu.memory_space<vmem>>, vector<8x8x128xf32>
    %cst_20 = arith.constant dense<0xFF800000> : vector<8x128xf32>
    %17 = vector.multi_reduction <maximumf>, %16, %cst_20 [0] : vector<8x8x128xf32> to vector<8x128xf32>
    %cst_21 = arith.constant dense<0xFF800000> : vector<128xf32>
    %18 = vector.multi_reduction <maximumf>, %17, %cst_21 [0] : vector<8x128xf32> to vector<128xf32>
    %19 = vector.shape_cast %18 : vector<128xf32> to vector<1x128xf32>
    %c0_22 = arith.constant 0 : index
    %c0_23 = arith.constant 0 : index
    %c0_24 = arith.constant 0 : index
    %20 = vector.load %arg1[%c0_22, %c0_23, %c0_24] : memref<16x16x128xf32, #tpu.memory_space<vmem>>, vector<5x5x128xf32>
    %cst_25 = arith.constant dense<0xFF800000> : vector<5x128xf32>
    %21 = vector.multi_reduction <maximumf>, %20, %cst_25 [0] : vector<5x5x128xf32> to vector<5x128xf32>
    %cst_26 = arith.constant dense<0xFF800000> : vector<128xf32>
    %22 = vector.multi_reduction <maximumf>, %21, %cst_26 [0] : vector<5x128xf32> to vector<128xf32>
    %23 = vector.shape_cast %22 : vector<128xf32> to vector<1x128xf32>
    %c0_27 = arith.constant 0 : index
    %c5 = arith.constant 5 : index
    %c0_28 = arith.constant 0 : index
    %24 = vector.load %arg1[%c0_27, %c5, %c0_28] : memref<16x16x128xf32, #tpu.memory_space<vmem>>, vector<5x6x128xf32>
    %cst_29 = arith.constant dense<0xFF800000> : vector<6x128xf32>
    %25 = vector.multi_reduction <maximumf>, %24, %cst_29 [0] : vector<5x6x128xf32> to vector<6x128xf32>
    %cst_30 = arith.constant dense<0xFF800000> : vector<128xf32>
    %26 = vector.multi_reduction <maximumf>, %25, %cst_30 [0] : vector<6x128xf32> to vector<128xf32>
    %27 = vector.shape_cast %26 : vector<128xf32> to vector<1x128xf32>
    %c0_31 = arith.constant 0 : index
    %c11 = arith.constant 11 : index
    %c0_32 = arith.constant 0 : index
    %28 = vector.load %arg1[%c0_31, %c11, %c0_32] : memref<16x16x128xf32, #tpu.memory_space<vmem>>, vector<5x5x128xf32>
    %cst_33 = arith.constant dense<0xFF800000> : vector<5x128xf32>
    %29 = vector.multi_reduction <maximumf>, %28, %cst_33 [0] : vector<5x5x128xf32> to vector<5x128xf32>
    %cst_34 = arith.constant dense<0xFF800000> : vector<128xf32>
    %30 = vector.multi_reduction <maximumf>, %29, %cst_34 [0] : vector<5x128xf32> to vector<128xf32>
    %31 = vector.shape_cast %30 : vector<128xf32> to vector<1x128xf32>
    %c5_35 = arith.constant 5 : index
    %c0_36 = arith.constant 0 : index
    %c0_37 = arith.constant 0 : index
    %32 = vector.load %arg1[%c5_35, %c0_36, %c0_37] : memref<16x16x128xf32, #tpu.memory_space<vmem>>, vector<6x5x128xf32>
    %cst_38 = arith.constant dense<0xFF800000> : vector<5x128xf32>
    %33 = vector.multi_reduction <maximumf>, %32, %cst_38 [0] : vector<6x5x128xf32> to vector<5x128xf32>
    %cst_39 = arith.constant dense<0xFF800000> : vector<128xf32>
    %34 = vector.multi_reduction <maximumf>, %33, %cst_39 [0] : vector<5x128xf32> to vector<128xf32>
    %35 = vector.shape_cast %34 : vector<128xf32> to vector<1x128xf32>
    %c5_40 = arith.constant 5 : index
    %c5_41 = arith.constant 5 : index
    %c0_42 = arith.constant 0 : index
    %36 = vector.load %arg1[%c5_40, %c5_41, %c0_42] : memref<16x16x128xf32, #tpu.memory_space<vmem>>, vector<6x6x128xf32>
    %cst_43 = arith.constant dense<0xFF800000> : vector<6x128xf32>
    %37 = vector.multi_reduction <maximumf>, %36, %cst_43 [0] : vector<6x6x128xf32> to vector<6x128xf32>
    %cst_44 = arith.constant dense<0xFF800000> : vector<128xf32>
    %38 = vector.multi_reduction <maximumf>, %37, %cst_44 [0] : vector<6x128xf32> to vector<128xf32>
    %39 = vector.shape_cast %38 : vector<128xf32> to vector<1x128xf32>
    %c5_45 = arith.constant 5 : index
    %c11_46 = arith.constant 11 : index
    %c0_47 = arith.constant 0 : index
    %40 = vector.load %arg1[%c5_45, %c11_46, %c0_47] : memref<16x16x128xf32, #tpu.memory_space<vmem>>, vector<6x5x128xf32>
    %cst_48 = arith.constant dense<0xFF800000> : vector<5x128xf32>
    %41 = vector.multi_reduction <maximumf>, %40, %cst_48 [0] : vector<6x5x128xf32> to vector<5x128xf32>
    %cst_49 = arith.constant dense<0xFF800000> : vector<128xf32>
    %42 = vector.multi_reduction <maximumf>, %41, %cst_49 [0] : vector<5x128xf32> to vector<128xf32>
    %43 = vector.shape_cast %42 : vector<128xf32> to vector<1x128xf32>
    %c11_50 = arith.constant 11 : index
    %c0_51 = arith.constant 0 : index
    %c0_52 = arith.constant 0 : index
    %44 = vector.load %arg1[%c11_50, %c0_51, %c0_52] : memref<16x16x128xf32, #tpu.memory_space<vmem>>, vector<5x5x128xf32>
    %cst_53 = arith.constant dense<0xFF800000> : vector<5x128xf32>
    %45 = vector.multi_reduction <maximumf>, %44, %cst_53 [0] : vector<5x5x128xf32> to vector<5x128xf32>
    %cst_54 = arith.constant dense<0xFF800000> : vector<128xf32>
    %46 = vector.multi_reduction <maximumf>, %45, %cst_54 [0] : vector<5x128xf32> to vector<128xf32>
    %47 = vector.shape_cast %46 : vector<128xf32> to vector<1x128xf32>
    %c11_55 = arith.constant 11 : index
    %c5_56 = arith.constant 5 : index
    %c0_57 = arith.constant 0 : index
    %48 = vector.load %arg1[%c11_55, %c5_56, %c0_57] : memref<16x16x128xf32, #tpu.memory_space<vmem>>, vector<5x6x128xf32>
    %cst_58 = arith.constant dense<0xFF800000> : vector<6x128xf32>
    %49 = vector.multi_reduction <maximumf>, %48, %cst_58 [0] : vector<5x6x128xf32> to vector<6x128xf32>
    %cst_59 = arith.constant dense<0xFF800000> : vector<128xf32>
    %50 = vector.multi_reduction <maximumf>, %49, %cst_59 [0] : vector<6x128xf32> to vector<128xf32>
    %51 = vector.shape_cast %50 : vector<128xf32> to vector<1x128xf32>
    %c11_60 = arith.constant 11 : index
    %c11_61 = arith.constant 11 : index
    %c0_62 = arith.constant 0 : index
    %52 = vector.load %arg1[%c11_60, %c11_61, %c0_62] : memref<16x16x128xf32, #tpu.memory_space<vmem>>, vector<5x5x128xf32>
    %cst_63 = arith.constant dense<0xFF800000> : vector<5x128xf32>
    %53 = vector.multi_reduction <maximumf>, %52, %cst_63 [0] : vector<5x5x128xf32> to vector<5x128xf32>
    %cst_64 = arith.constant dense<0xFF800000> : vector<128xf32>
    %54 = vector.multi_reduction <maximumf>, %53, %cst_64 [0] : vector<5x128xf32> to vector<128xf32>
    %55 = vector.shape_cast %54 : vector<128xf32> to vector<1x128xf32>
    %56 = tpu.concatenate %3, %7, %11, %15, %19, %23, %27, %31, %35, %39, %43, %47, %51, %55 in 0 : vector<1x128xf32>, vector<1x128xf32>, vector<1x128xf32>, vector<1x128xf32>, vector<1x128xf32>, vector<1x128xf32>, vector<1x128xf32>, vector<1x128xf32>, vector<1x128xf32>, vector<1x128xf32>, vector<1x128xf32>, vector<1x128xf32>, vector<1x128xf32>, vector<1x128xf32> -> vector<14x128xf32>
    %c0_65 = arith.constant 0 : index
    %c0_66 = arith.constant 0 : index
    %57 = vector.load %arg2[%c0_65, %c0_66] : memref<14x128xf32, #tpu.memory_space<vmem>>, vector<14x128xf32>
    tpu.vector_store %arg2[%c0_65, %c0_66], %56 {strides = array<i32>} : memref<14x128xf32, #tpu.memory_space<vmem>>, vector<14x128xf32>,
    return
  }
  func.func @transform_0(%arg0: i32) -> (i32, i32, i32) {
    %c0_i32 = arith.constant 0 : i32
    %c0_i32_0 = arith.constant 0 : i32
    %c0_i32_1 = arith.constant 0 : i32
    return %c0_i32, %c0_i32_0, %arg0 : i32, i32, i32
  }
  func.func @transform_1(%arg0: i32) -> (i32, i32) {
    %c0_i32 = arith.constant 0 : i32
    %c0_i32_0 = arith.constant 0 : i32
    return %c0_i32, %arg0 : i32, i32
  }
}

</mosaic_0001>

<bundles_post_ra>
// kernel: spp_layer.1
= control target key start
LH: loop header
LB: loop body
LE: loop exit
PB: predicated region body
PF: predicated region fallthrough
CT: control target
= control target key end

     0   :  { %vm167_vm0 = vcmask 1044480   ;;  %vm189_vm1 = vcmask 1045504   ;;  %vm364_vm2 = vcmask 1040384   ;;  %vm366_vm3 = vcmask 1041408   ;;  %s798_s0 = inlined_call_operand.vmem [shape: f32[16,16,128], index: 0, kind: input, shape index: {}]   ;;  %s799_s1 = inlined_call_operand.vmem [shape: f32[14,128], index: 1, kind: output, shape index: {}]  }
   0x1   :  { %v8_v0 = vld [vmem:[%s798_s0] sm:$0xff]  ;;  %v9_v1 = vld [vmem:[%s798_s0 + $0x8] sm:$0xff]  ;;  %v10_v2 = vld [vmem:[%s798_s0 + $0x10] sm:$0xff]  ;;  %vm368_vm4 = vcmask 1042432   ;;  %vm370_vm5 = vcmask 1043456   ;;  %vm374_vm6 = vcmask 1046528  }
   0x2   :  { %v11_v3 = vld [vmem:[%s798_s0 + $0x18] sm:$0xff]  ;;  %v12_v4 = vld [vmem:[%s798_s0 + $0x20] sm:$0xff]  ;;  %v13_v5 = vld [vmem:[%s798_s0 + $0x28] sm:$0xff] }
   0x3   :  { %v14_v6 = vld [vmem:[%s798_s0 + $0x30] sm:$0xff]  ;;  %v15_v7 = vld [vmem:[%s798_s0 + $0x38] sm:$0xff]  ;;  %v16_v8 = vld [vmem:[%s798_s0 + $0x40] sm:$0xff]  ;;  %v40_v9 = vmax.f32 %v8_v0, %v12_v4  ;;  %v55_v10 = vmax.f32 %v9_v1, %v13_v5 }
   0x4   :  { %v17_v11 = vld [vmem:[%s798_s0 + $0x48] sm:$0xff]  ;;  %v18_v12 = vld [vmem:[%s798_s0 + $0x50] sm:$0xff]  ;;  %v19_v13 = vld [vmem:[%s798_s0 + $0x58] sm:$0xff]  ;;  %v41_v14 = vmax.f32 %v10_v2, %v14_v6  ;;  %v56_v15 = vmax.f32 %v11_v3, %v15_v7  ;;  %v85_v16 = vmax.f32 %v8_v0, %v16_v8 }
   0x5   :  { %v20_v17 = vld [vmem:[%s798_s0 + $0x60] sm:$0xff]  ;;  %v21_v18 = vld [vmem:[%s798_s0 + $0x68] sm:$0xff]  ;;  %v22_v19 = vld [vmem:[%s798_s0 + $0x70] sm:$0xff]  ;;  %v42_v20 = vmax.f32 %v40_v9, %v16_v8  ;;  %v57_v21 = vmax.f32 %v55_v10, %v17_v11  ;;  %v86_v22 = vmax.f32 %v10_v2, %v18_v12  ;;  %v106_v23 = vmax.f32 %v9_v1, %v17_v11 }
   0x6   :  { %v23_v24 = vld [vmem:[%s798_s0 + $0x78] sm:$0xff]  ;;  %v24_v25 = vld [vmem:[%s798_s0 + $0x80] sm:$0xff]  ;;  %v500_v26 = vld [vmem:[%s798_s0 + $0x88] sm:$0xff]  ;;  %v43_v27 = vmax.f32 %v41_v14, %v18_v12  ;;  %v58_v28 = vmax.f32 %v56_v15, %v19_v13  ;;  %v87_v29 = vmax.f32 %v12_v4, %v20_v17  ;;  %v88_v30 = vmax.f32 %v14_v6, %v22_v19 }
   0x7   :  { %v26_v31 = vld [vmem:[%s798_s0 + $0x90] sm:$0xff]  ;;  %v508_v32 = vld [vmem:[%s798_s0 + $0x98] sm:$0xff]  ;;  %v44_v33 = vmax.f32 %v42_v20, %v20_v17  ;;  %v59_v34 = vmax.f32 %v57_v21, %v21_v18  ;;  %v89_v35 = vmax.f32 %v85_v16, %v86_v22  ;;  %v107_v36 = vmax.f32 %v11_v3, %v19_v13  ;;  %v28_v37 = vld [vmem:[%s798_s0 + $0xa0] sm:$0xff] }
   0x8   :  { %v516_v38 = vld [vmem:[%s798_s0 + $0xa8] sm:$0xff]  ;;  %v45_v39 = vmax.f32 %v43_v27, %v22_v19  ;;  %v60_v40 = vmax.f32 %v58_v28, %v23_v24  ;;  %v90_v41 = vmax.f32 %v87_v29, %v88_v30  ;;  %v108_v42 = vmax.f32 %v13_v5, %v21_v18  ;;  %v30_v43 = vld [vmem:[%s798_s0 + $0xb0] sm:$0xff]  ;;  %v31_v44 = vld [vmem:[%s798_s0 + $0xb8] sm:$0xff] }
   0x9   :  { %v32_v45 = vld [vmem:[%s798_s0 + $0xc0] sm:$0xff]  ;;  %v46_v46 = vmax.f32 %v44_v33, %v24_v25  ;;  %v61_v47 = vmax.f32 %v59_v34, %v500_v26  ;;  %v109_v48 = vmax.f32 %v15_v7, %v23_v24  ;;  %v110_v49 = vmax.f32 %v106_v23, %v107_v36  ;;  %v33_v50 = vld [vmem:[%s798_s0 + $0xc8] sm:$0xff]  ;;  %v34_v51 = vld [vmem:[%s798_s0 + $0xd0] sm:$0xff] }
   0xa   :  { %v47_v52 = vmax.f32 %v45_v39, %v26_v31  ;;  %v62_v53 = vmax.f32 %v60_v40, %v508_v32  ;;  %v91_v54 = vmax.f32 %v89_v35, %v90_v41  ;;  %v128_v55 = vmax.f32 %v24_v25, %v32_v45  ;;  %v35_v56 = vld [vmem:[%s798_s0 + $0xd8] sm:$0xff]  ;;  %v36_v57 = vld [vmem:[%s798_s0 + $0xe0] sm:$0xff]  ;;  %v37_v62 = vld [vmem:[%s798_s0 + $0xe8] sm:$0xff] }
   0xb   :  { %v48_v58 = vmax.f32 %v46_v46, %v28_v37  ;;  %v63_v59 = vmax.f32 %v61_v47, %v516_v38  ;;  %v111_v60 = vmax.f32 %v108_v42, %v109_v48  ;;  %v129_v61 = vmax.f32 %v26_v31, %v34_v51  ;;  %v38_v63 = vld [vmem:[%s798_s0 + $0xf0] sm:$0xff]  ;;  %v39_v4 = vld [vmem:[%s798_s0 + $0xf8] sm:$0xff]  ;;  %v162_v25 = vld [vmem:[%s798_s0] sm:$0x1f] }
   0xc   :  { %v49_v0 = vmax.f32 %v47_v52, %v30_v43  ;;  %v64_v1 = vmax.f32 %v62_v53, %v31_v44  ;;  %v92_v2 = vrot.slane %v91_v54, 4  ;;  %v130_v3 = vmax.f32 %v28_v37, %v36_v57  ;;  %v164_v30 = vld [vmem:[%s798_s0 + $0x20] sm:$0x1f]  ;;  %v163_v35 = vld [vmem:[%s798_s0 + $0x10] sm:$0x1f] }
   0xd   :  { %v50_v5 = vmax.f32 %v48_v58, %v32_v45  ;;  %v65_v6 = vmax.f32 %v63_v59, %v33_v50  ;;  %v112_v7 = vmax.f32 %v110_v49, %v111_v60  ;;  %v131_v8 = vmax.f32 %v30_v43, %v38_v63  ;;  %v166_v36 = vld [vmem:[%s798_s0 + $0x40] sm:$0x1f]  ;;  %v185_v45 = vld [vmem:[%s798_s0 + $0x15] sm:$0x3f] }
   0xe   :  { %v51_v9 = vmax.f32 %v49_v0, %v34_v51  ;;  %v66_v10 = vmax.f32 %v64_v1, %v35_v56  ;;  %v93_v11 = vmax.f32 %v91_v54, %v92_v2  ;;  %v132_v12 = vmax.f32 %v128_v55, %v129_v61  ;;  %v187_v55 = vld [vmem:[%s798_s0 + $0x35] sm:$0x3f]  ;;  %v206_v1 = vld [vmem:[%s798_s0 + $0xb] sm:$0x1f] }
   0xf   :  { %v52_v13 = vmax.f32 %v50_v5, %v36_v57  ;;  %v67_v14 = vmax.f32 %v65_v6, %v37_v62  ;;  %v113_v15 = vrot.slane %v112_v7, 4  ;;  %v133_v16 = vmax.f32 %v130_v3, %v131_v8  ;;  %v208_v6 = vld [vmem:[%s798_s0 + $0x2b] sm:$0x1f] }
  0x10   :  { %v53_v17 = vmax.f32 %v51_v9, %v38_v63  ;;  %v68_v18 = vmax.f32 %v66_v10, %v39_v4  ;;  %v94_v19 = vrot.slane %v93_v11, 2  ;;  %v149_v20 = vmax.f32 %v500_v26, %v33_v50  ;;  %v165_v26 = vld [vmem:[%s798_s0 + $0x30] sm:$0x1f]  ;;  %v186_v50 = vld [vmem:[%s798_s0 + $0x25] sm:$0x3f] }
  0x11   :  { %v114_v21 = vmax.f32 %v112_v7, %v113_v15  ;;  %v134_v22 = vmax.f32 %v132_v12, %v133_v16  ;;  %v150_v23 = vmax.f32 %v508_v32, %v35_v56  ;;  %v151_v24 = vmax.f32 %v516_v38, %v37_v62  ;;  %v188_v56 = vld [vmem:[%s798_s0 + $0x45] sm:$0x3f]  ;;  %v209_v12 = vld [vmem:[%s798_s0 + $0x3b] sm:$0x1f]  ;;  %v210_v16 = vld [vmem:[%s798_s0 + $0x4b] sm:$0x1f] }
  0x12   :  { %v54_v27 = vmax.f32 %v52_v13, %v53_v17  ;;  %v69_v28 = vmax.f32 %v67_v14, %v68_v18  ;;  %v152_v29 = vmax.f32 %v31_v44, %v39_v4  ;;  %v95_v31 = vmax.f32 %v93_v11, %v94_v19  ;;  %v184_v44 = vld [vmem:[%s798_s0 + $0x5] sm:$0x3f]  ;;  %v207_v11 = vld [vmem:[%s798_s0 + $0x1b] sm:$0x1f]  ;;  %v403_v17 = vld [vmem:[%s798_s0 + $0x50] sm:$0x1f] }
  0x13   :  { %v115_v32 = vrot.slane %v114_v21, 2  ;;  %v135_v33 = vrot.slane %v134_v22, 4  ;;  %v153_v34 = vmax.f32 %v149_v20, %v150_v23  ;;  %v168_v39 = vsel %vm167_vm0, %v162_v25, -inf }
  0x14   :  { %v70_v37 = vmax.f32 %v54_v27, %v69_v28  ;;  %v154_v38 = vmax.f32 %v151_v24, %v152_v29  ;;  %v170_v42 = vsel %vm167_vm0, %v164_v30, -inf  ;;  %v171_v43 = vsel %vm167_vm0, %v165_v26, -inf  ;;  %v406_v28 = vld [vmem:[%s798_s0 + $0x80] sm:$0x1f] }
  0x15   :  { %v116_v40 = vmax.f32 %v114_v21, %v115_v32  ;;  %v136_v41 = vmax.f32 %v134_v22, %v135_v33  ;;  %v169_v48 = vsel %vm167_vm0, %v163_v35, -inf  ;;  %v172_v49 = vsel %vm167_vm0, %v166_v36, -inf  ;;  %v405_v22 = vld [vmem:[%s798_s0 + $0x70] sm:$0x1f]  ;;  %v404_v32 = vld [vmem:[%s798_s0 + $0x60] sm:$0x1f] }
  0x16   :  { %v71_v46 = vrot.slane %v70_v37, 4  ;;  %v155_v47 = vmax.f32 %v153_v34, %v154_v38  ;;  %v96_v51 = vrot.slane %v95_v31, 1  ;;  %v173_v53 = vmax.f32 %v168_v39, %v172_v49  ;;  %v407_v33 = vld [vmem:[%s798_s0 + $0x90] sm:$0x1f]  ;;  %v408_v38 = vld [vmem:[%s798_s0 + $0xa0] sm:$0x1f] }
  0x17   :  { %v137_v52 = vrot.slane %v136_v41, 2  ;;  %v175_v54 = vmax.f32 %v170_v42, %v171_v43  ;;  %v117_v58 = vrot.slane %v116_v40, 1  ;;  %v190_v60 = vsel %vm189_vm1, %v184_v44, -inf  ;;  %v409_v39 = vld [vmem:[%s798_s0 + $0x55] sm:$0x3f] }
  0x18   :  { %v72_v57 = vmax.f32 %v70_v37, %v71_v46  ;;  %v156_v59 = vrot.slane %v155_v47, 4  ;;  %v174_v62 = vmax.f32 %v173_v53, %v169_v48  ;;  %v191_v63 = vsel %vm189_vm1, %v185_v45, -inf  ;;  %v411_v45 = vld [vmem:[%s798_s0 + $0x75] sm:$0x3f] }
  0x19   :  { %v138_v61 = vmax.f32 %v136_v41, %v137_v52  ;;  %v192_v0 = vsel %vm189_vm1, %v186_v50, -inf  ;;  %v193_v4 = vsel %vm189_vm1, %v187_v55, -inf  ;;  %v194_v5 = vsel %vm189_vm1, %v188_v56, -inf  ;;  %v412_v50 = vld [vmem:[%s798_s0 + $0x85] sm:$0x3f] }
  0x1a   :  { %v73_v2 = vrot.slane %v72_v57, 2  ;;  %v157_v3 = vmax.f32 %v155_v47, %v156_v59  ;;  %v176_v8 = vmax.f32 %v174_v62, %v175_v54  ;;  %v195_v9 = vmax.f32 %v190_v60, %v194_v5  ;;  %v413_v54 = vld [vmem:[%s798_s0 + $0x95] sm:$0x3f]  ;;  %v414_v60 = vld [vmem:[%s798_s0 + $0xa5] sm:$0x3f] }
  0x1b   :  { %v139_v7 = vrot.slane %v138_v61, 1  ;;  %v197_v10 = vmax.f32 %v192_v0, %v193_v4  ;;  %v606_v14 = vmax.f32 %v95_v31, %v96_v51  ;;  %v211_v20 = vsel %vm167_vm0, %v206_v1, -inf  ;;  %v415_v1 = vld [vmem:[%s798_s0 + $0x5b] sm:$0x1f] }
  0x1c   :  { %v74_v13 = vmax.f32 %v72_v57, %v73_v2  ;;  %v158_v15 = vrot.slane %v157_v3, 2  ;;  %v177_v18 = vsel %vm167_vm0, %v176_v8, -inf  ;;  %v196_v19 = vmax.f32 %v195_v9, %v191_v63 }
  0x1d   :  { %v213_v21 = vsel %vm167_vm0, %v208_v6, -inf  ;;  %v620_v23 = vmax.f32 %v116_v40, %v117_v58  ;;  %v178_v24 = vrot.slane %v177_v18, 4  ;;  %v212_v25 = vsel %vm167_vm0, %v207_v11, -inf  ;;  %v410_v40 = vld [vmem:[%s798_s0 + $0x65] sm:$0x3f] }
  0x1e   :  { %v214_v27 = vsel %vm167_vm0, %v209_v12, -inf  ;;  %v75_v29 = vrot.slane %v74_v13, 1  ;;  %v627_v30 = vmax.f32 %v138_v61, %v139_v7  ;;  %v198_v26 = vmax.f32 %v196_v19, %v197_v10  ;;  %v416_v6 = vld [vmem:[%s798_s0 + $0x6b] sm:$0x1f]  ;;  %v417_v11 = vld [vmem:[%s798_s0 + $0x7b] sm:$0x1f] }
  0x1f   :  { %v215_v31 = vsel %vm167_vm0, %v210_v16, -inf  ;;  %v636_v34 = vmax.f32 %v157_v3, %v158_v15  ;;  %v179_v35 = vmax.f32 %v177_v18, %v178_v24  ;;  %v218_v37 = vmax.f32 %v213_v21, %v214_v27  ;;  %v418_v12 = vld [vmem:[%s798_s0 + $0x8b] sm:$0x1f]  ;;  %v419_v18 = vld [vmem:[%s798_s0 + $0x9b] sm:$0x1f] }
  0x20   :  { %v216_v36 = vmax.f32 %v211_v20, %v215_v31  ;;  %v199_v41 = vsel %vm189_vm1, %v198_v26, -inf  ;;  %v234_v42 = vsel %vm167_vm0, %v403_v17, -inf  ;;  %v236_v43 = vsel %vm167_vm0, %v405_v22, -inf  ;;  %v420_v19 = vld [vmem:[%s798_s0 + $0xab] sm:$0x1f] }
  0x21   :  { %v237_v44 = vsel %vm167_vm0, %v406_v28, -inf  ;;  %v180_v46 = vrot.slane %v179_v35, 2  ;;  %v200_v47 = vrot.slane %v199_v41, 4  ;;  %v235_v49 = vsel %vm167_vm0, %v404_v32, -inf  ;;  %v421_v26 = vld [vmem:[%s798_s0 + $0xb0] sm:$0x1f] }
  0x22   :  { %v217_v48 = vmax.f32 %v216_v36, %v212_v25  ;;  %v238_v51 = vsel %vm167_vm0, %v407_v33, -inf  ;;  %v240_v52 = vsel %vm167_vm0, %v408_v38, -inf  ;;  %v243_v53 = vmax.f32 %v236_v43, %v237_v44  ;;  %v423_v36 = vld [vmem:[%s798_s0 + $0xd0] sm:$0x1f] }
  0x23   :  { %v258_v55 = vsel %vm189_vm1, %v409_v39, -inf  ;;  %v181_v56 = vmax.f32 %v179_v35, %v180_v46  ;;  %v201_v57 = vmax.f32 %v199_v41, %v200_v47  ;;  %v239_v59 = vmax.f32 %v234_v42, %v238_v51  ;;  %v422_v41 = vld [vmem:[%s798_s0 + $0xc0] sm:$0x1f]  ;;  %v426_v47 = vld [vmem:[%s798_s0 + $0xb5] sm:$0x3f] }
  0x24   :  { %v219_v58 = vmax.f32 %v217_v48, %v218_v37  ;;  %v241_v61 = vmax.f32 %v235_v49, %v240_v52  ;;  %v259_v62 = vsel %vm189_vm1, %v410_v40, -inf  ;;  %v260_v63 = vsel %vm189_vm1, %v411_v45, -inf  ;;  %v424_v42 = vld [vmem:[%s798_s0 + $0xe0] sm:$0x1f]  ;;  %v427_v52 = vld [vmem:[%s798_s0 + $0xc5] sm:$0x3f] }
  0x25   :  { %v261_v0 = vsel %vm189_vm1, %v412_v50, -inf  ;;  %v673_v2 = vmax.f32 %v74_v13, %v75_v29  ;;  %v202_v3 = vrot.slane %v201_v57, 2  ;;  %v262_v5 = vsel %vm189_vm1, %v413_v54, -inf }
  0x26   :  { %v220_v4 = vsel %vm167_vm0, %v219_v58, -inf  ;;  %v242_v8 = vmax.f32 %v239_v59, %v241_v61  ;;  %v263_v9 = vmax.f32 %v258_v55, %v262_v5  ;;  %v264_v10 = vsel %vm189_vm1, %v414_v60, -inf  ;;  %v429_v58 = vld [vmem:[%s798_s0 + $0xe5] sm:$0x3f]  ;;  %v431_v5 = vld [vmem:[%s798_s0 + $0xbb] sm:$0x1f] }
  0x27   :  { %v221_v7 = vrot.slane %v220_v4, 4  ;;  %v160_v13 = vrot.slane %v636_v34, 1  ;;  %v182_v15 = vrot.slane %v181_v56, 1  ;;  %v265_v16 = vmax.f32 %v259_v62, %v264_v10  ;;  %v432_v10 = vld [vmem:[%s798_s0 + $0xcb] sm:$0x1f] }
  0x28   :  { %v267_v17 = vmax.f32 %v260_v63, %v261_v0  ;;  %v694_v20 = vmax.f32 %v201_v57, %v202_v3  ;;  %v244_v22 = vmax.f32 %v242_v8, %v243_v53  ;;  %v282_v24 = vsel %vm167_vm0, %v415_v1, -inf  ;;  %v428_v57 = vld [vmem:[%s798_s0 + $0xd5] sm:$0x3f] }
  0x29   :  { %v222_v21 = vmax.f32 %v220_v4, %v221_v7  ;;  %v266_v25 = vmax.f32 %v263_v9, %v265_v16  ;;  %v283_v27 = vsel %vm167_vm0, %v416_v6, -inf  ;;  %v284_v28 = vsel %vm167_vm0, %v417_v11, -inf  ;;  %v430_v63 = vld [vmem:[%s798_s0 + $0xf5] sm:$0x3f]  ;;  %v433_v16 = vld [vmem:[%s798_s0 + $0xdb] sm:$0x1f] }
  0x2a   :  { %v285_v29 = vsel %vm167_vm0, %v418_v12, -inf  ;;  %v245_v32 = vsel %vm167_vm0, %v244_v22, -inf  ;;  %v286_v33 = vsel %vm167_vm0, %v419_v18, -inf  ;;  %v288_v35 = vsel %vm167_vm0, %v420_v19, -inf  ;;  %v434_v22 = vld [vmem:[%s798_s0 + $0xeb] sm:$0x1f] }
  0x2b   :  { %v223_v31 = vrot.slane %v222_v21, 2  ;;  %v710_v37 = vmax.f32 %v636_v34, %v160_v13  ;;  %v246_v38 = vrot.slane %v245_v32, 4  ;;  %v268_v39 = vmax.f32 %v266_v25, %v267_v17  ;;  %v425_v34 = vld [vmem:[%s798_s0 + $0xf0] sm:$0x1f] }
  0x2c   :  { %v287_v40 = vmax.f32 %v282_v24, %v286_v33  ;;  %v718_v43 = vmax.f32 %v181_v56, %v182_v15  ;;  %v204_v44 = vrot.slane %v694_v20, 1  ;;  %v289_v45 = vmax.f32 %v283_v27, %v288_v35  ;;  %v435_v24 = vld [vmem:[%s798_s0 + $0xfb] sm:$0x1f] }
  0x2d   :  { %v291_v46 = vmax.f32 %v284_v28, %v285_v29  ;;  %v247_v48 = vmax.f32 %v245_v32, %v246_v38  ;;  %v269_v49 = vsel %vm189_vm1, %v268_v39, -inf  ;;  %v306_v50 = vsel %vm167_vm0, %v421_v26, -inf }
  0x2e   :  { %v308_v51 = vsel %vm167_vm0, %v423_v36, -inf  ;;  %v224_v53 = vmax.f32 %v222_v21, %v223_v31  ;;  %v270_v54 = vrot.slane %v269_v49, 4  ;;  %v290_v55 = vmax.f32 %v287_v40, %v289_v45 }
  0x2f   :  { %v309_v56 = vsel %vm167_vm0, %v424_v42, -inf  ;;  %v248_v59 = vrot.slane %v247_v48, 2  ;;  %v307_v60 = vsel %vm167_vm0, %v422_v41, -inf  ;;  %v310_v61 = vsel %vm167_vm0, %v425_v34, -inf }
  0x30   :  { %v313_v62 = vmax.f32 %v308_v51, %v309_v56  ;;  %v271_v0 = vmax.f32 %v269_v49, %v270_v54  ;;  %v292_v1 = vmax.f32 %v290_v55, %v291_v46  ;;  %v311_v3 = vmax.f32 %v306_v50, %v310_v61 }
  0x31   :  { %v327_v4 = vsel %vm189_vm1, %v426_v47, -inf  ;;  %v249_v6 = vmax.f32 %v247_v48, %v248_v59  ;;  %v328_v7 = vsel %vm189_vm1, %v427_v52, -inf  ;;  %v329_v8 = vsel %vm189_vm1, %v428_v57, -inf }
  0x32   :  { %v330_v9 = vsel %vm189_vm1, %v429_v58, -inf  ;;  %v272_v11 = vrot.slane %v271_v0, 2  ;;  %v293_v12 = vsel %vm167_vm0, %v292_v1, -inf  ;;  %v312_v13 = vmax.f32 %v311_v3, %v307_v60 }
  0x33   :  { %v331_v15 = vsel %vm189_vm1, %v430_v63, -inf  ;;  %v225_v17 = vrot.slane %v224_v53, 1  ;;  %v294_v18 = vrot.slane %v293_v12, 4  ;;  %v334_v21 = vmax.f32 %v329_v8, %v330_v9 }
  0x34   :  { %v332_v19 = vmax.f32 %v327_v4, %v331_v15  ;;  %v250_v25 = vrot.slane %v249_v6, 1  ;;  %v273_v27 = vmax.f32 %v271_v0, %v272_v11  ;;  %v314_v28 = vmax.f32 %v312_v13, %v313_v62 }
  0x35   :  { %v348_v29 = vsel %vm167_vm0, %v431_v5, -inf  ;;  %v295_v26 = vmax.f32 %v293_v12, %v294_v18  ;;  %v349_v32 = vsel %vm167_vm0, %v432_v10, -inf  ;;  %v350_v33 = vsel %vm167_vm0, %v433_v16, -inf }
  0x36   :  { %v333_v31 = vmax.f32 %v332_v19, %v328_v7  ;;  %v274_v35 = vrot.slane %v273_v27, 1  ;;  %v315_v36 = vsel %vm167_vm0, %v314_v28, -inf  ;;  %v351_v38 = vsel %vm167_vm0, %v434_v22, -inf }
  0x37   :  { %v352_v39 = vsel %vm167_vm0, %v435_v24, -inf  ;;  %v296_v40 = vrot.slane %v295_v26, 2  ;;  %v316_v41 = vrot.slane %v315_v36, 4  ;;  %v205_v46 = vmax.f32 %v694_v20, %v204_v44 }
  0x38   :  { %v335_v42 = vmax.f32 %v333_v31, %v334_v21  ;;  %v353_v45 = vmax.f32 %v348_v29, %v352_v39  ;;  %v226_v34 = vmax.f32 %v224_v53, %v225_v17  ;;  %v355_v47 = vmax.f32 %v350_v33, %v351_v38 }
  0x39   :  { %v365_v48 = vsel %vm364_vm2, %v673_v2, %v606_v14  ;;  %v297_v49 = vmax.f32 %v295_v26, %v296_v40  ;;  %v317_v50 = vmax.f32 %v315_v36, %v316_v41  ;;  %v251_v54 = vmax.f32 %v249_v6, %v250_v25 }
  0x3a   :  { %v336_v51 = vsel %vm189_vm1, %v335_v42, -inf  ;;  %v354_v52 = vmax.f32 %v353_v45, %v349_v32  ;;  %v275_v55 = vmax.f32 %v273_v27, %v274_v35  ;;  %v367_v57 = vsel %vm366_vm3, %v365_v48, %v620_v23 }
  0x3b   :  { %v337_v56 = vrot.slane %v336_v51, 4  ;;  %v298_v58 = vrot.slane %v297_v49, 1  ;;  %v318_v59 = vrot.slane %v317_v50, 2  ;;  %v369_v44 = vsel %vm368_vm4, %v367_v57, %v627_v30 }
  0x3c   :  { %v356_v20 = vmax.f32 %v354_v52, %v355_v47  ;;  %v371_v14 = vsel %vm370_vm5, %v369_v44, %v710_v37  ;;  %v376_v1 = vsel %vm364_vm2, %v251_v54, %v275_v55 }
  0x3d   :  { %v338_v53 = vmax.f32 %v336_v51, %v337_v56  ;;  %v299_v2 = vmax.f32 %v297_v49, %v298_v58  ;;  %v319_v60 = vmax.f32 %v317_v50, %v318_v59  ;;  %v372_v62 = vsel %vm167_vm0, %v371_v14, %v718_v43 }
  0x3e   :  { %v357_v61 = vsel %vm167_vm0, %v356_v20, -inf  ;;  %v373_v0 = vsel %vm189_vm1, %v372_v62, %v205_v46 }
  0x3f   :  { %v339_v63 = vrot.slane %v338_v53, 2  ;;  %v358_v23 = vrot.slane %v357_v61, 4  ;;  %v320_v3 = vrot.slane %v319_v60, 1  ;;  %v375_v30 = vsel %vm374_vm6, %v373_v0, %v226_v34 }
  0x40   :  { %381 = vst [vmem:[%s799_s1] sm:$0xff] %v375_v30  ;;  %v377_v6 = vsel %vm366_vm3, %v376_v1, %v299_v2 }
  0x41   :  { %v340_v4 = vmax.f32 %v338_v53, %v339_v63  ;;  %v359_v5 = vmax.f32 %v357_v61, %v358_v23  ;;  %v321_v37 = vmax.f32 %v319_v60, %v320_v3 }
  0x43   :  { %v341_v7 = vrot.slane %v340_v4, 1  ;;  %v360_v8 = vrot.slane %v359_v5, 2  ;;  %v378_v10 = vsel %vm368_vm4, %v377_v6, %v321_v37 }
  0x45   :  { %v342_v43 = vmax.f32 %v340_v4, %v341_v7  ;;  %v361_v9 = vmax.f32 %v359_v5, %v360_v8 }
  0x47   :  { %v362_v11 = vrot.slane %v361_v9, 1  ;;  %v379_v12 = vsel %vm370_vm5, %v378_v10, %v342_v43 }
  0x49   :  { %v363_v13 = vmax.f32 %v361_v9, %v362_v11 }
  0x4b   :  { %v380_v15 = vsel %vm167_vm0, %v379_v12, %v363_v13 }
  0x4c   :  { %382 = vst [vmem:[%s799_s1 + $0x8] sm:$0x3f] %v380_v15 }

</bundles_post_ra>
